<compile_context>
chip_gen: v5e
topology: v5e:2x2
jax: 0.10.0
libtpu: 0.0.40
codegen_flags: <defaults>
</compile_context>

<pallas_src>
import functools
import math

import jax
import jax.numpy as jnp
from jax.experimental import pallas as pl
from jax.experimental.pallas import tpu as pltpu

_LANE = 128


def _nnet2_kernel(x_ref, m_ref, y_ref, p_ref, *, fold, w):
    # x_ref / m_ref / y_ref : (bc_tile, Hk, fold*w)  lane-dense blocks
    # p_ref                 : (bc_tile, w)
    y = x_ref[...] * m_ref[...]            # VPU elementwise
    y_ref[...] = y                         # lane-dense (multiple-of-128) store
    t = jnp.sum(y, axis=1)                 # sublane (Hk) reduce on XLU: (bc_tile, fold*w)
    # Fold the `fold` width-w sub-segments packed along the lane axis
    # (they correspond to the h % fold sub-rows of the original H axis).
    acc = t[:, 0:w]
    for s in range(1, fold):
        acc = acc + t[:, s * w:(s + 1) * w]
    p_ref[...] = acc                       # (bc_tile, w); tiny traffic vs y


def _lane_fold_factor(H, W):
    """Largest k with H % k == 0 and (k*W) % 128 == 0; 1 if impossible."""
    k = _LANE // math.gcd(W, _LANE)
    return k if H % k == 0 else 1


def _pick_bc_tile(BC, row_bytes, target_bytes=2 * 1024 * 1024):
    """Tile of the fused B*C axis: big blocks, multiple of 8, divides BC."""
    if BC <= 8:
        return BC
    t = max(8, min(BC, target_bytes // max(row_bytes, 1)))
    t = (t // 8) * 8
    # Leave at least 2 parallel grid steps so v7x's two TensorCores both work.
    if BC // t < 2:
        t = max(8, ((BC // 2) // 8) * 8)
    while t > 8 and BC % t != 0:
        t -= 8
    if BC % t != 0:
        t = BC  # fallback: full axis in one block (always layout-legal)
    return t


def nnet2_forward(x, mat):
    """Returns (y, p) with y = x * mat, p = y.sum(axis=2)."""
    assert x.shape == mat.shape and x.ndim == 4
    B, C, H, W = x.shape
    itemsize = jnp.dtype(x.dtype).itemsize

    # Contiguous (no-data-movement) reshape to a lane-dense slab.
    k = _lane_fold_factor(H, W)
    BC, Hk, Wk = B * C, H // k, k * W
    x2 = x.reshape(BC, Hk, Wk)
    m2 = mat.reshape(BC, Hk, Wk)

    bc_tile = _pick_bc_tile(BC, Hk * Wk * itemsize)
    grid = (BC // bc_tile,)

    kernel = functools.partial(_nnet2_kernel, fold=k, w=W)

    grid_spec = pltpu.PrefetchScalarGridSpec(
        num_scalar_prefetch=0,
        grid=grid,
        in_specs=[
            pl.BlockSpec((bc_tile, Hk, Wk), lambda i: (i, 0, 0)),
            pl.BlockSpec((bc_tile, Hk, Wk), lambda i: (i, 0, 0)),
        ],
        out_specs=[
            pl.BlockSpec((bc_tile, Hk, Wk), lambda i: (i, 0, 0)),
            pl.BlockSpec((bc_tile, W), lambda i: (i, 0)),
        ],
    )

    y2, p2 = pl.pallas_call(
        kernel,
        out_shape=(
            jax.ShapeDtypeStruct((BC, Hk, Wk), x.dtype),
            jax.ShapeDtypeStruct((BC, W), x.dtype),
        ),
        grid_spec=grid_spec,
        compiler_params=pltpu.CompilerParams(
            dimension_semantics=("parallel",),
            vmem_limit_bytes=48 * 1024 * 1024,  # >default scoped, < v7x 64 MiB physical
        ),
        cost_estimate=pl.CostEstimate(
            flops=2 * B * C * H * W,
            transcendentals=0,
            bytes_accessed=(3 * B * C * H * W + B * C * W) * itemsize,
        ),
    )(x2, m2)

    # Free reshapes back to the PyTorch NCHW views.
    return y2.reshape(B, C, H, W), p2.reshape(B, C, W)


if __name__ == "__main__":
    # Small shape consistent with an NCHW input that broadcasts against the
    # parameter `mat` (same shape as h / x).
    B, C, H, W = 2, 4, 16, 16

    key = jax.random.PRNGKey(0)
    kx, kmat = jax.random.split(key)
    x = jax.random.normal(kx, (B, C, H, W), dtype=jnp.float32)
    # Deterministic stand-in for torch.rand_like(h) (uniform [0, 1)).
    mat = jax.random.uniform(kmat, (B, C, H, W), dtype=jnp.float32)

    y, p = nnet2_forward(x, mat)
    jax.block_until_ready((y, p))

    # Reference check in plain JAX.
    y_ref = x * mat
    p_ref = jnp.sum(y_ref, axis=2)
    assert jnp.allclose(y, y_ref, atol=1e-6), "y mismatch"
    assert jnp.allclose(p, p_ref, atol=1e-5), "p mismatch"

    print("KERNEL_OK")
</pallas_src>

<mosaic_0001>
module attributes {stable_mosaic.version = 11 : i64} {
  func.func @_nnet2_kernel(%arg0: i32, %arg1: memref<8x2x128xf32, #tpu.memory_space<vmem>>, %arg2: memref<8x2x128xf32, #tpu.memory_space<vmem>>, %arg3: memref<8x2x128xf32, #tpu.memory_space<vmem>>, %arg4: memref<8x16xf32, #tpu.memory_space<vmem>>) attributes {dimension_semantics = [#tpu.dimension_semantics<parallel>], iteration_bounds = array<i64: 1>, scalar_prefetch = 0 : i64, scratch_operands = 0 : i64, tpu.core_type = #tpu.core_type<tc>, window_params = [{transform_indices = @transform_0, window_bounds = array<i64: 8, 2, 128>}, {transform_indices = @transform_1, window_bounds = array<i64: 8, 2, 128>}, {transform_indices = @transform_2, window_bounds = array<i64: 8, 2, 128>}, {transform_indices = @transform_3, window_bounds = array<i64: 8, 16>}]} {
    %c0 = arith.constant 0 : index
    %c0_0 = arith.constant 0 : index
    %c0_1 = arith.constant 0 : index
    %0 = vector.load %arg1[%c0, %c0_0, %c0_1] : memref<8x2x128xf32, #tpu.memory_space<vmem>>, vector<8x2x128xf32>
    %c0_2 = arith.constant 0 : index
    %c0_3 = arith.constant 0 : index
    %c0_4 = arith.constant 0 : index
    %1 = vector.load %arg2[%c0_2, %c0_3, %c0_4] : memref<8x2x128xf32, #tpu.memory_space<vmem>>, vector<8x2x128xf32>
    %2 = arith.mulf %0, %1 : vector<8x2x128xf32>
    %c0_5 = arith.constant 0 : index
    %c0_6 = arith.constant 0 : index
    %c0_7 = arith.constant 0 : index
    %3 = vector.load %arg3[%c0_5, %c0_6, %c0_7] : memref<8x2x128xf32, #tpu.memory_space<vmem>>, vector<8x2x128xf32>
    tpu.vector_store %arg3[%c0_5, %c0_6, %c0_7], %2 {strides = array<i32>} : memref<8x2x128xf32, #tpu.memory_space<vmem>>, vector<8x2x128xf32>,
    %cst = arith.constant dense<0.000000e+00> : vector<8x128xf32>
    %4 = vector.multi_reduction <add>, %2, %cst [1] : vector<8x2x128xf32> to vector<8x128xf32>
    %5 = vector.extract_strided_slice %4 {offsets = [0, 0], sizes = [8, 16], strides = [1, 1]} : vector<8x128xf32> to vector<8x16xf32>
    %6 = vector.extract_strided_slice %4 {offsets = [0, 16], sizes = [8, 16], strides = [1, 1]} : vector<8x128xf32> to vector<8x16xf32>
    %7 = arith.addf %5, %6 : vector<8x16xf32>
    %8 = vector.extract_strided_slice %4 {offsets = [0, 32], sizes = [8, 16], strides = [1, 1]} : vector<8x128xf32> to vector<8x16xf32>
    %9 = arith.addf %7, %8 : vector<8x16xf32>
    %10 = vector.extract_strided_slice %4 {offsets = [0, 48], sizes = [8, 16], strides = [1, 1]} : vector<8x128xf32> to vector<8x16xf32>
    %11 = arith.addf %9, %10 : vector<8x16xf32>
    %12 = vector.extract_strided_slice %4 {offsets = [0, 64], sizes = [8, 16], strides = [1, 1]} : vector<8x128xf32> to vector<8x16xf32>
    %13 = arith.addf %11, %12 : vector<8x16xf32>
    %14 = vector.extract_strided_slice %4 {offsets = [0, 80], sizes = [8, 16], strides = [1, 1]} : vector<8x128xf32> to vector<8x16xf32>
    %15 = arith.addf %13, %14 : vector<8x16xf32>
    %16 = vector.extract_strided_slice %4 {offsets = [0, 96], sizes = [8, 16], strides = [1, 1]} : vector<8x128xf32> to vector<8x16xf32>
    %17 = arith.addf %15, %16 : vector<8x16xf32>
    %18 = vector.extract_strided_slice %4 {offsets = [0, 112], sizes = [8, 16], strides = [1, 1]} : vector<8x128xf32> to vector<8x16xf32>
    %19 = arith.addf %17, %18 : vector<8x16xf32>
    %c0_8 = arith.constant 0 : index
    %c0_9 = arith.constant 0 : index
    %20 = vector.load %arg4[%c0_8, %c0_9] : memref<8x16xf32, #tpu.memory_space<vmem>>, vector<8x16xf32>
    tpu.vector_store %arg4[%c0_8, %c0_9], %19 {strides = array<i32>} : memref<8x16xf32, #tpu.memory_space<vmem>>, vector<8x16xf32>,
    return
  }
  func.func @transform_0(%arg0: i32) -> (i32, i32, i32) {
    %c0_i32 = arith.constant 0 : i32
    %c0_i32_0 = arith.constant 0 : i32
    %c0_i32_1 = arith.constant 0 : i32
    return %arg0, %c0_i32, %c0_i32_0 : i32, i32, i32
  }
  func.func @transform_1(%arg0: i32) -> (i32, i32, i32) {
    %c0_i32 = arith.constant 0 : i32
    %c0_i32_0 = arith.constant 0 : i32
    %c0_i32_1 = arith.constant 0 : i32
    return %arg0, %c0_i32, %c0_i32_0 : i32, i32, i32
  }
  func.func @transform_2(%arg0: i32) -> (i32, i32, i32) {
    %c0_i32 = arith.constant 0 : i32
    %c0_i32_0 = arith.constant 0 : i32
    %c0_i32_1 = arith.constant 0 : i32
    return %arg0, %c0_i32, %c0_i32_0 : i32, i32, i32
  }
  func.func @transform_3(%arg0: i32) -> (i32, i32) {
    %c0_i32 = arith.constant 0 : i32
    %c0_i32_0 = arith.constant 0 : i32
    return %arg0, %c0_i32 : i32, i32
  }
}

</mosaic_0001>

<bundles_post_ra>
// kernel: tpu_custom_call.1
= control target key start
LH: loop header
LB: loop body
LE: loop exit
PB: predicated region body
PF: predicated region fallthrough
CT: control target
= control target key end

     0   :  { %9 = vsyncpa [#allocation3], 0  ;;  %s712_s0 = inlined_call_operand.hbm [shape: f32[8,2,128], index: 0, kind: input, shape index: {}]   ;;  %s713_s1 = inlined_call_operand.hbm [shape: f32[8,2,128], index: 1, kind: input, shape index: {}]   ;;  %s714_s2 = inlined_call_operand.hbm [shape: f32[8,2,128], index: 2, kind: output, shape index: {0}]   ;;  %s715_s3 = inlined_call_operand.hbm [shape: f32[8,16], index: 3, kind: output, shape index: {1}]  }
   0x1   :  { %10 = vsyncpa [#allocation6], 0 }
   0x2   :  { %11 = vsyncpa [#allocation4], 0 }
   0x3   :  { %12 = vsyncpa [#allocation9], 0  ;;  %s17_s14 = sshll.u32 %s712_s0, 4  ;;  %s552_s15 = smov [#allocation2]   ;;  %s18_s14 = int_to_ptr.hbm [resolvable:$true] %s17_s14 }
   0x4   :  { %s19_s16 = sshll.u32 %s552_s15, 4  ;;  %s30_s19 = sshll.u32 %s713_s1, 4  ;;  %s20_s16 = int_to_ptr.vmem [resolvable:$true] %s19_s16  ;;  %s31_s19 = int_to_ptr.hbm [resolvable:$true] %s30_s19 }
   0x5   :  { %s553_s20 = smov 32   ;;  %s554_s21 = smov 2  }
   0x6   :  { %25 = dma.hbm_to_vmem [thread:$0]  %s18_s14, 256, %s20_s16, [#allocation3], %s553_s20, %s553_s20, %s554_s21  }
   0x7   :  { %s555_s22 = smov [#allocation5]  }
   0x8   :  { %s32_s23 = sshll.u32 %s555_s22, 4  ;;  %s33_s23 = int_to_ptr.vmem [resolvable:$true] %s32_s23 }
   0x9   :  { %38 = dma.hbm_to_vmem [thread:$0]  %s31_s19, 256, %s33_s23, [#allocation6], %s553_s20, %s553_s20, %s554_s21  }
   0xa   :  { %544 = dma.done.wait [#allocation3], 256  }
   0xb   :  { %545 = vsyncadd [#allocation3], 4294967040 }
   0xc   :  { %546 = dma.done.wait [#allocation6], 256  }
   0xd   :  { %547 = vsyncadd [#allocation6], 4294967040  ;;  %vm79_vm0 = vcmask 1041408   ;;  %v51_v0 = vld [vmem:[#allocation2 + $0x8] sm:$0x3]  ;;  %s556_s0 = smov 112  }
   0xe   :  { %v59_v1 = vld [vmem:[#allocation5 + $0x8] sm:$0x3]  ;;  %v49_v2 = vld [vmem:[#allocation2 + $0x4] sm:$0x3]  ;;  %v57_v4 = vld [vmem:[#allocation5 + $0x4] sm:$0x3] }
   0xf   :  { %v67_v3 = vmul.f32 %v59_v1, %v51_v0  ;;  %v47_v5 = vld [vmem:[#allocation2] sm:$0x3]  ;;  %v55_v6 = vld [vmem:[#allocation5] sm:$0x3]  ;;  %v65_v7 = vmul.f32 %v57_v4, %v49_v2  ;;  %v52_v9 = vld [vmem:[#allocation2 + $0xa] sm:$0x3] }
  0x10   :  { %v63_v8 = vmul.f32 %v55_v6, %v47_v5  ;;  %v60_v10 = vld [vmem:[#allocation5 + $0xa] sm:$0x3]  ;;  %v50_v11 = vld [vmem:[#allocation2 + $0x6] sm:$0x3]  ;;  %v58_v14 = vld [vmem:[#allocation5 + $0x6] sm:$0x3] }
  0x11   :  { %v108_v12 = vsel %vm79_vm0, %v67_v3, 0.0  ;;  %75 = vst [vmem:[#allocation7 + $0x8] sm:$0x3] %v67_v3  ;;  %v68_v13 = vmul.f32 %v60_v10, %v52_v9  ;;  %v94_v16 = vsel %vm79_vm0, %v65_v7, 0.0  ;;  %v66_v18 = vmul.f32 %v58_v14, %v50_v11  ;;  %v48_v25 = vld [vmem:[#allocation2 + $0x2] sm:$0x3] }
  0x12   :  { %v109_v15 = vrot.slane %v108_v12, 4  ;;  %73 = vst [vmem:[#allocation7 + $0x4] sm:$0x3] %v65_v7  ;;  %v80_v17 = vsel %vm79_vm0, %v63_v8, 0.0  ;;  %v95_v19 = vrot.slane %v94_v16, 4  ;;  %s557_s1 = smov 96  }
  0x13   :  { %v81_v20 = vrot.slane %v80_v17, 4  ;;  %71 = vst [vmem:[#allocation7] sm:$0x3] %v63_v8  ;;  %v115_v21 = vsel %vm79_vm0, %v68_v13, 0.0  ;;  %v101_v24 = vsel %vm79_vm0, %v66_v18, 0.0  ;;  %s558_s24 = smov 80  }
  0x14   :  { %v110_v22 = vadd.f32 %v109_v15, %v108_v12  ;;  %v116_v23 = vrot.slane %v115_v21, 4  ;;  %76 = vst [vmem:[#allocation7 + $0xa] sm:$0x3] %v68_v13  ;;  %v96_v26 = vadd.f32 %v95_v19, %v94_v16  ;;  %v102_v28 = vrot.slane %v101_v24, 4  ;;  %v56_v29 = vld [vmem:[#allocation5 + $0x2] sm:$0x3] }
  0x15   :  { %v82_v27 = vadd.f32 %v81_v20, %v80_v17  ;;  %74 = vst [vmem:[#allocation7 + $0x6] sm:$0x3] %v66_v18  ;;  %v64_v32 = vmul.f32 %v56_v29, %v48_v25  ;;  %v54_v33 = vld [vmem:[#allocation2 + $0xe] sm:$0x3]  ;;  %v62_v34 = vld [vmem:[#allocation5 + $0xe] sm:$0x3] }
  0x16   :  { %v111_v30 = vrot.slane %v110_v22, 2  ;;  %v117_v31 = vadd.f32 %v116_v23, %v115_v21  ;;  %v97_v35 = vrot.slane %v96_v26, 2  ;;  %v103_v37 = vadd.f32 %v102_v28, %v101_v24  ;;  %v53_v39 = vld [vmem:[#allocation2 + $0xc] sm:$0x3]  ;;  %v61_v40 = vld [vmem:[#allocation5 + $0xc] sm:$0x3] }
  0x17   :  { %v83_v36 = vrot.slane %v82_v27, 2  ;;  %v70_v38 = vmul.f32 %v62_v34, %v54_v33  ;;  %v87_v43 = vsel %vm79_vm0, %v64_v32, 0.0  ;;  %72 = vst [vmem:[#allocation7 + $0x2] sm:$0x3] %v64_v32  ;;  %v69_v44 = vmul.f32 %v61_v40, %v53_v39  ;;  %s559_s25 = smov 64   ;;  %s560_s26 = smov 48  }
  0x18   :  { %v112_v41 = vadd.f32 %v111_v30, %v110_v22  ;;  %v118_v42 = vrot.slane %v117_v31, 2  ;;  %v98_v45 = vadd.f32 %v97_v35, %v96_v26  ;;  %v104_v47 = vrot.slane %v103_v37, 2  ;;  %s561_s27 = smov 16   ;;  %s406_s30 = sshll.u32 %s714_s2, 4  ;;  %s407_s30 = int_to_ptr.hbm [resolvable:$true] %s406_s30 }
  0x19   :  { %v84_v46 = vadd.f32 %v83_v36, %v82_v27  ;;  %v88_v48 = vrot.slane %v87_v43, 4  ;;  %78 = vst [vmem:[#allocation7 + $0xe] sm:$0x3] %v70_v38  ;;  %v129_v51 = vsel %vm79_vm0, %v70_v38, 0.0  ;;  %v122_v52 = vsel %vm79_vm0, %v69_v44, 0.0  ;;  %s562_s4 = smov [#allocation7]  }
  0x1a   :  { %v113_v49 = vrot.slane %v112_v41, 1  ;;  %v119_v50 = vadd.f32 %v118_v42, %v117_v31  ;;  %77 = vst [vmem:[#allocation7 + $0xc] sm:$0x3] %v69_v44  ;;  %v99_v53 = vrot.slane %v98_v45, 1  ;;  %v105_v55 = vadd.f32 %v104_v47, %v103_v37  ;;  %s404_s5 = sshll.u32 %s562_s4, 4  ;;  %s563_s2 = smov [#allocation8]   ;;  %s405_s5 = int_to_ptr.vmem [resolvable:$true] %s404_s5 }
  0x1b   :  { %v85_v54 = vrot.slane %v84_v46, 1  ;;  %v89_v56 = vadd.f32 %v88_v48, %v87_v43  ;;  %v130_v58 = vrot.slane %v129_v51, 4  ;;  %v123_v59 = vrot.slane %v122_v52, 4  ;;  %412 = dma.vmem_to_hbm [thread:$0]  %s405_s5, 256, %s407_s30, [#allocation4], %s553_s20, %s553_s20, %s554_s21  }
  0x1c   :  { %v604_v57 = vadd.f32 %v113_v49, %v112_v41  ;;  %v606_v60 = vadd.f32 %v99_v53, %v98_v45  ;;  %v120_v63 = vrot.slane %v119_v50, 1  ;;  %v106_v2 = vrot.slane %v105_v55, 1  ;;  %s418_s6 = sshll.u32 %s563_s2, 4  ;;  %s420_s9 = sshll.u32 %s715_s3, 4  ;;  %s419_s6 = int_to_ptr.vmem [resolvable:$true] %s418_s6  ;;  %s421_s9 = int_to_ptr.hbm [resolvable:$true] %s420_s9 }
  0x1d   :  { %v608_v61 = vadd.f32 %v85_v54, %v84_v46  ;;  %v90_v62 = vrot.slane %v89_v56, 2  ;;  %v131_v0 = vadd.f32 %v130_v58, %v129_v51  ;;  %v124_v1 = vadd.f32 %v123_v59, %v122_v52 }
  0x1e   :  { %152 = vrot.lane.b32.xlu2 %v604_v57, %s556_s0  ;;  %148 = vrot.lane.b32.xlu1 %v606_v60, %s556_s0  ;;  %v613_v7 = vadd.f32 %v120_v63, %v119_v50  ;;  %v615_v8 = vadd.f32 %v106_v2, %v105_v55  ;;  %vm377_vm1 = vcmask 1041409   ;;  %vm380_vm2 = vcmask 1042434  }
  0x1f   :  { %144 = vrot.lane.b32.xlu0 %v608_v61, %s556_s0  ;;  %v91_v3 = vadd.f32 %v90_v62, %v89_v56  ;;  %v132_v4 = vrot.slane %v131_v0, 2  ;;  %v125_v5 = vrot.slane %v124_v1, 2  ;;  %vm383_vm3 = vcmask 1043459  }
  0x20   :  { %vm386_vm4 = vcmask 1044484   ;;  %vm389_vm5 = vcmask 1045509   ;;  %vm392_vm6 = vcmask 1046534   ;;  %vm395_vm7 = vcmask 1047559  }
  0x21   :  { %v92_v6 = vrot.slane %v91_v3, 1  ;;  %v133_v10 = vadd.f32 %v132_v4, %v131_v0  ;;  %v126_v11 = vadd.f32 %v125_v5, %v124_v1  ;;  %vm398_vm8 = vcmask 130048  }
  0x23   :  { %v617_v9 = vadd.f32 %v92_v6, %v91_v3  ;;  %v134_v12 = vrot.slane %v133_v10, 1  ;;  %v127_v13 = vrot.slane %v126_v11, 1 }
  0x25   :  { %v622_v14 = vadd.f32 %v134_v12, %v133_v10  ;;  %v624_v15 = vadd.f32 %v127_v13, %v126_v11 }
  0x26   :  { %154 = vrot.lane.b32.xlu2 %v613_v7, %s556_s0  ;;  %150 = vrot.lane.b32.xlu1 %v615_v8, %s556_s0 }
  0x27   :  { %146 = vrot.lane.b32.xlu0 %v617_v9, %s556_s0 }
  0x2e   :  { %176 = vrot.lane.b32.xlu2 %v608_v61, %s557_s1  ;;  %158 = vrot.lane.b32.xlu1 %v622_v14, %s556_s0 }
  0x2f   :  { %156 = vrot.lane.b32.xlu0 %v624_v15, %s556_s0 }
  0x36   :  { %182 = vrot.lane.b32.xlu2 %v615_v8, %s557_s1  ;;  %180 = vrot.lane.b32.xlu1 %v606_v60, %s557_s1 }
  0x37   :  { %178 = vrot.lane.b32.xlu0 %v617_v9, %s557_s1 }
  0x3e   :  { %188 = vrot.lane.b32.xlu2 %v624_v15, %s557_s1  ;;  %186 = vrot.lane.b32.xlu1 %v613_v7, %s557_s1 }
  0x3f   :  { %184 = vrot.lane.b32.xlu0 %v604_v57, %s557_s1 }
  0x46   :  { %210 = vrot.lane.b32.xlu2 %v617_v9, %s558_s24  ;;  %208 = vrot.lane.b32.xlu1 %v608_v61, %s558_s24 }
  0x47   :  { %190 = vrot.lane.b32.xlu0 %v622_v14, %s557_s1 }
  0x4e   :  { %216 = vrot.lane.b32.xlu2 %v604_v57, %s558_s24  ;;  %214 = vrot.lane.b32.xlu1 %v615_v8, %s558_s24 }
  0x4f   :  { %212 = vrot.lane.b32.xlu0 %v606_v60, %s558_s24 }
  0x56   :  { %222 = vrot.lane.b32.xlu2 %v622_v14, %s558_s24  ;;  %220 = vrot.lane.b32.xlu1 %v624_v15, %s558_s24 }
  0x57   :  { %218 = vrot.lane.b32.xlu0 %v613_v7, %s558_s24 }
  0x5e   :  { %244 = vrot.lane.b32.xlu2 %v606_v60, %s559_s25  ;;  %242 = vrot.lane.b32.xlu1 %v617_v9, %s559_s25 }
  0x5f   :  { %240 = vrot.lane.b32.xlu0 %v608_v61, %s559_s25 }
  0x66   :  { %250 = vrot.lane.b32.xlu2 %v613_v7, %s559_s25  ;;  %248 = vrot.lane.b32.xlu1 %v604_v57, %s559_s25 }
  0x67   :  { %246 = vrot.lane.b32.xlu0 %v615_v8, %s559_s25 }
  0x6e   :  { %272 = vrot.lane.b32.xlu2 %v608_v61, %s560_s26  ;;  %254 = vrot.lane.b32.xlu1 %v622_v14, %s559_s25 }
  0x6f   :  { %252 = vrot.lane.b32.xlu0 %v624_v15, %s559_s25 }
  0x76   :  { %278 = vrot.lane.b32.xlu2 %v615_v8, %s560_s26  ;;  %276 = vrot.lane.b32.xlu1 %v606_v60, %s560_s26 }
  0x77   :  { %274 = vrot.lane.b32.xlu0 %v617_v9, %s560_s26 }
  0x78   :  { %v153_v16 = vpop.permute.xlu2 %152 }
  0x79   :  { %v172_v42 = vadd.f32 %v153_v16, %v604_v57 }
  0x7e   :  { %284 = vrot.lane.b32.xlu2 %v624_v15, %s560_s26  ;;  %282 = vrot.lane.b32.xlu1 %v613_v7, %s560_s26 }
  0x7f   :  { %280 = vrot.lane.b32.xlu0 %v604_v57, %s560_s26 }
  0x80   :  { %v155_v17 = vpop.permute.xlu2 %154 }
  0x81   :  { %v173_v43 = vadd.f32 %v155_v17, %v613_v7 }
  0x86   :  { %304 = vrot.lane.b32.xlu2 %v608_v61, %s553_s20  ;;  %308 = vrot.lane.b32.xlu1 %v606_v60, %s553_s20 }
  0x87   :  { %306 = vrot.lane.b32.xlu0 %v617_v9, %s553_s20 }
  0x88   :  { %v177_v18 = vpop.permute.xlu2 %176 }
  0x8e   :  { %312 = vrot.lane.b32.xlu2 %v604_v57, %s553_s20  ;;  %338 = vrot.lane.b32.xlu1 %v617_v9, %s561_s27 }
  0x8f   :  { %310 = vrot.lane.b32.xlu0 %v615_v8, %s553_s20 }
  0x90   :  { %v183_v19 = vpop.permute.xlu2 %182  ;;  %v149_v20 = vpop.permute.xlu1 %148 }
  0x91   :  { %v145_v21 = vpop.permute.xlu0 %144  ;;  %v170_v34 = vadd.f32 %v149_v20, %v606_v60 }
  0x92   :  { %v168_v22 = vadd.f32 %v145_v21, %v608_v61 }
  0x94   :  { %v200_v23 = vadd.f32 %v177_v18, %v168_v22 }
  0x96   :  { %314 = vrot.lane.b32.xlu2 %v613_v7, %s553_s20  ;;  %286 = vrot.lane.b32.xlu1 %v622_v14, %s560_s26 }
  0x97   :  { %340 = vrot.lane.b32.xlu0 %v606_v60, %s561_s27 }
  0x98   :  { %v189_v24 = vpop.permute.xlu2 %188  ;;  %v151_v25 = vpop.permute.xlu1 %150 }
  0x99   :  { %v147_v26 = vpop.permute.xlu0 %146  ;;  %v171_v27 = vadd.f32 %v151_v25, %v615_v8 }
  0x9a   :  { %v169_v35 = vadd.f32 %v147_v26, %v617_v9 }
  0x9b   :  { %v203_v28 = vadd.f32 %v183_v19, %v171_v27 }
  0x9e   :  { %316 = vrot.lane.b32.xlu2 %v624_v15, %s553_s20  ;;  %342 = vrot.lane.b32.xlu1 %v615_v8, %s561_s27 }
  0x9f   :  { %336 = vrot.lane.b32.xlu0 %v608_v61, %s561_s27 }
  0xa0   :  { %v211_v29 = vpop.permute.xlu2 %210  ;;  %v159_v30 = vpop.permute.xlu1 %158 }
  0xa1   :  { %v157_v31 = vpop.permute.xlu0 %156  ;;  %v175_v50 = vadd.f32 %v159_v30, %v622_v14 }
  0xa2   :  { %v174_v32 = vadd.f32 %v157_v31, %v624_v15 }
  0xa4   :  { %v206_v33 = vadd.f32 %v189_v24, %v174_v32 }
  0xa6   :  { %346 = vrot.lane.b32.xlu2 %v613_v7, %s561_s27  ;;  %318 = vrot.lane.b32.xlu1 %v622_v14, %s553_s20 }
  0xa7   :  { %344 = vrot.lane.b32.xlu0 %v604_v57, %s561_s27 }
  0xa8   :  { %v217_v36 = vpop.permute.xlu2 %216  ;;  %v181_v37 = vpop.permute.xlu1 %180 }
  0xa9   :  { %v179_v38 = vpop.permute.xlu0 %178  ;;  %v202_v39 = vadd.f32 %v181_v37, %v170_v34 }
  0xaa   :  { %v201_v40 = vadd.f32 %v179_v38, %v169_v35 }
  0xac   :  { %v233_v41 = vadd.f32 %v211_v29, %v201_v40 }
  0xae   :  { %350 = vrot.lane.b32.xlu1 %v622_v14, %s561_s27 }
  0xaf   :  { %348 = vrot.lane.b32.xlu0 %v624_v15, %s561_s27 }
  0xb0   :  { %v187_v44 = vpop.permute.xlu1 %186  ;;  %v223_v47 = vpop.permute.xlu2 %222 }
  0xb1   :  { %v185_v45 = vpop.permute.xlu0 %184  ;;  %v205_v46 = vadd.f32 %v187_v44, %v173_v43 }
  0xb2   :  { %v204_v48 = vadd.f32 %v185_v45, %v172_v42 }
  0xb4   :  { %v236_v49 = vadd.f32 %v217_v36, %v204_v48 }
  0xb8   :  { %v209_v51 = vpop.permute.xlu1 %208  ;;  %v245_v55 = vpop.permute.xlu2 %244 }
  0xb9   :  { %v191_v52 = vpop.permute.xlu0 %190  ;;  %v232_v53 = vadd.f32 %v209_v51, %v200_v23 }
  0xba   :  { %v207_v54 = vadd.f32 %v191_v52, %v175_v50 }
  0xbc   :  { %v706_v56 = vadd.f32 %v223_v47, %v207_v54 }
  0xc0   :  { %v215_v58 = vpop.permute.xlu1 %214  ;;  %v251_v61 = vpop.permute.xlu2 %250 }
  0xc1   :  { %v213_v59 = vpop.permute.xlu0 %212  ;;  %v235_v57 = vadd.f32 %v215_v58, %v203_v28 }
  0xc2   :  { %v234_v60 = vadd.f32 %v213_v59, %v202_v39 }
  0xc4   :  { %v266_v24 = vadd.f32 %v245_v55, %v234_v60 }
  0xc8   :  { %v221_v62 = vpop.permute.xlu1 %220  ;;  %v273_v2 = vpop.permute.xlu2 %272 }
  0xc9   :  { %v219_v63 = vpop.permute.xlu0 %218  ;;  %v238_v0 = vadd.f32 %v221_v62, %v206_v33 }
  0xca   :  { %v237_v1 = vadd.f32 %v219_v63, %v205_v46 }
  0xcc   :  { %v269_v40 = vadd.f32 %v251_v61, %v237_v1 }
  0xd0   :  { %v243_v3 = vpop.permute.xlu1 %242  ;;  %v279_v9 = vpop.permute.xlu2 %278 }
  0xd1   :  { %v241_v4 = vpop.permute.xlu0 %240  ;;  %v265_v5 = vadd.f32 %v243_v3, %v233_v41 }
  0xd2   :  { %v264_v6 = vadd.f32 %v241_v4, %v232_v53 }
  0xd4   :  { %v296_v33 = vadd.f32 %v273_v2, %v264_v6 }
  0xd8   :  { %v249_v7 = vpop.permute.xlu1 %248  ;;  %v285_v12 = vpop.permute.xlu2 %284 }
  0xd9   :  { %v247_v8 = vpop.permute.xlu0 %246  ;;  %v268_v39 = vadd.f32 %v249_v7, %v236_v49 }
  0xda   :  { %v267_v27 = vadd.f32 %v247_v8, %v235_v57 }
  0xdc   :  { %v299_v35 = vadd.f32 %v279_v9, %v267_v27 }
  0xe0   :  { %v255_v10 = vpop.permute.xlu1 %254  ;;  %v305_v15 = vpop.permute.xlu2 %304 }
  0xe1   :  { %v253_v11 = vpop.permute.xlu0 %252  ;;  %v328_v37 = vadd.f32 %v305_v15, %v296_v33  ;;  %v271_v62 = vadd.f32 %v255_v10, %v706_v56 }
  0xe2   :  { %v270_v60 = vadd.f32 %v253_v11, %v238_v0 }
  0xe4   :  { %v302_v2 = vadd.f32 %v285_v12, %v270_v60 }
  0xe8   :  { %v277_v13 = vpop.permute.xlu1 %276  ;;  %v313_v18 = vpop.permute.xlu2 %312 }
  0xe9   :  { %v275_v14 = vpop.permute.xlu0 %274  ;;  %v298_v29 = vadd.f32 %v277_v13, %v266_v24 }
  0xea   :  { %v297_v28 = vadd.f32 %v275_v14, %v265_v5 }
  0xf0   :  { %v283_v16 = vpop.permute.xlu1 %282  ;;  %v315_v23 = vpop.permute.xlu2 %314 }
  0xf1   :  { %v281_v17 = vpop.permute.xlu0 %280  ;;  %v301_v46 = vadd.f32 %v283_v16, %v269_v40 }
  0xf2   :  { %v300_v48 = vadd.f32 %v281_v17, %v268_v39 }
  0xf3   :  { %v333_v55 = vadd.f32 %v315_v23, %v301_v46 }
  0xf4   :  { %v332_v58 = vadd.f32 %v313_v18, %v300_v48 }
  0xf8   :  { %v309_v19 = vpop.permute.xlu1 %308  ;;  %v317_v30 = vpop.permute.xlu2 %316 }
  0xf9   :  { %v307_v20 = vpop.permute.xlu0 %306  ;;  %v330_v32 = vadd.f32 %v309_v19, %v298_v29  ;;  %v334_v6 = vadd.f32 %v317_v30, %v302_v2 }
  0xfa   :  { %v329_v31 = vadd.f32 %v307_v20, %v297_v28 }
 0x100   :  { %v339_v21 = vpop.permute.xlu1 %338  ;;  %v347_v53 = vpop.permute.xlu2 %346 }
 0x101   :  { %v311_v22 = vpop.permute.xlu0 %310  ;;  %v361_v34 = vadd.f32 %v339_v21, %v329_v31  ;;  %v365_v49 = vadd.f32 %v347_v53, %v333_v55 }
 0x102   :  { %v331_v38 = vadd.f32 %v311_v22, %v299_v35 }
 0x103   :  { %v376_v43 = vrot.slane %v361_v34, 7  ;;  %v388_v1 = vrot.slane %v365_v49, 3 }
 0x108   :  { %v287_v25 = vpop.permute.xlu1 %286 }
 0x109   :  { %v341_v26 = vpop.permute.xlu0 %340  ;;  %v303_v3 = vadd.f32 %v287_v25, %v271_v62 }
 0x10a   :  { %v362_v36 = vadd.f32 %v341_v26, %v330_v32 }
 0x10c   :  { %v379_v47 = vrot.slane %v362_v36, 6 }
 0x110   :  { %v343_v41 = vpop.permute.xlu1 %342 }
 0x111   :  { %v337_v42 = vpop.permute.xlu0 %336  ;;  %v363_v44 = vadd.f32 %v343_v41, %v331_v38 }
 0x112   :  { %v360_v45 = vadd.f32 %v337_v42, %v328_v37 }
 0x113   :  { %v382_v50 = vrot.slane %v363_v44, 5 }
 0x114   :  { %v378_v51 = vsel %vm377_vm1, %v376_v43, %v360_v45 }
 0x115   :  { %v381_v52 = vsel %vm380_vm2, %v379_v47, %v378_v51 }
 0x116   :  { %v384_v54 = vsel %vm383_vm3, %v382_v50, %v381_v52 }
 0x118   :  { %v319_v59 = vpop.permute.xlu1 %318 }
 0x119   :  { %v345_v57 = vpop.permute.xlu0 %344  ;;  %v335_v7 = vadd.f32 %v319_v59, %v303_v3 }
 0x11a   :  { %v364_v61 = vadd.f32 %v345_v57, %v332_v58 }
 0x11c   :  { %v385_v63 = vrot.slane %v364_v61, 4 }
 0x11e   :  { %v387_v4 = vsel %vm386_vm4, %v385_v63, %v384_v54 }
 0x11f   :  { %v390_v5 = vsel %vm389_vm5, %v388_v1, %v387_v4 }
 0x120   :  { %v351_v8 = vpop.permute.xlu1 %350 }
 0x121   :  { %v349_v9 = vpop.permute.xlu0 %348  ;;  %v367_v13 = vadd.f32 %v351_v8, %v335_v7 }
 0x122   :  { %v366_v14 = vadd.f32 %v349_v9, %v334_v6 }
 0x123   :  { %v394_v56 = vrot.slane %v367_v13, 1 }
 0x124   :  { %v391_v0 = vrot.slane %v366_v14, 2 }
 0x126   :  { %v393_v10 = vsel %vm392_vm6, %v391_v0, %v390_v5 }
 0x127   :  { %v396_v11 = vsel %vm395_vm7, %v394_v56, %v393_v10 }
 0x128   :  { %399 = vst.msk [vmem:[#allocation8] sm:$0xff] %vm398_vm8, %v396_v11 }
 0x129   :  { %423 = dma.vmem_to_hbm [thread:$0]  %s419_s6, 128, %s421_s9, [#allocation9]  }
 0x12a   :  { %548 = dma.done.wait [#allocation4], 256  }
 0x12b   :  { %549 = vsyncadd [#allocation4], 4294967040 }
 0x12c   :  { %550 = dma.done.wait [#allocation9], 128  }
 0x12d   :  { %551 = vsyncadd [#allocation9], 4294967168 }
 0x12e   :  { %432 = vsyncpa [#allocation3], 1 }
 0x12f   :  { %433 = vsyncpa [#allocation6], 1 }
 0x130   :  { %434 = vsyncpa [#allocation4], 1 }
 0x131   :  { %435 = vsyncpa [#allocation9], 1 }

</bundles_post_ra>
